<compile_context>
chip_gen: v7x
topology: tpu7x:2x2x1
jax: 0.10.0
libtpu: 0.0.40
codegen_flags: <defaults>
</compile_context>

<pallas_src>
import jax
import jax.numpy as jnp
from jax.experimental import pallas as pl
from jax.experimental.pallas import tpu as pltpu


_VMEM_LIMIT_BYTES = 32 * 1024 * 1024  # safe scoped-VMEM cap on v5e/v6e/v7x


def _attention_pool_kernel(x_ref, qw_ref, o_ref):
    # x_ref : (TB, S, D) native-dtype block of the input stream
    # qw_ref: (1, D)     f32, pre-scaled (query @ W) / sqrt(D); bias cancels
    # o_ref : (TB, D)    pooled output block (sublane- and lane-dense)
    xf = x_ref[...].astype(jnp.float32)            # f32 math path (v5e-safe)
    qw = qw_ref[...]                               # (1, D) f32

    # scores[b, s] = <qw, x[b, s, :]>   (1/sqrt(D) already folded into qw)
    # VPU multiply + lane reduction on a dense (TB, S) layout; MXU stays idle
    # and the tiny compute hides under the x DMA stream.
    scores = jnp.sum(xf * qw, axis=-1)             # (TB, S) f32

    # Numerically-stable softmax over S; normalization deferred to the end.
    m = jnp.max(scores, axis=-1, keepdims=True)    # (TB, 1)
    p = jnp.exp(scores - m)                        # (TB, S)
    denom = jnp.sum(p, axis=-1, keepdims=True)     # (TB, 1)

    # pooled[b, d] = sum_s p[b, s] * x[b, s, d] / denom[b]
    num = jnp.sum(p[:, :, None] * xf, axis=1)      # (TB, D) f32
    # Exact divide: denom is only TB scalars, approx reciprocal buys nothing.
    o_ref[...] = (num / denom).astype(o_ref.dtype)


def _pick_block_b(B, S, D, itemsize, *, vmem_limit_bytes=_VMEM_LIMIT_BYTES):
    """VMEM- and pipeline-aware batch block size (multiple of 8 or full B)."""
    budget = int(0.7 * vmem_limit_bytes)
    # Per batch row resident per grid step: double-buffered native x block,
    # one f32 copy of the row for the VPU math, plus small (S,)/(D,) vectors.
    per_row = S * D * (2 * itemsize + 4) + 4 * (S + D) + 4096
    fit = max(1, budget // per_row)
    if B <= 8 or fit < 8:
        # Tiny batch, or VMEM-starved (huge S*D): just take what fits.
        # TODO(synk): for huge S*D add a second 'arbitrary' grid axis over S
        # (flash-style online softmax) instead of shrinking block_b below 8.
        return int(min(B, fit))
    # Aim for >= 4 (small B) / >= 8 (large B) grid steps so DMA of block i+1
    # overlaps compute of block i and v7x's two TensorCores both get work.
    min_steps = 8 if B >= 64 else 4
    bb = max(8, (B // min_steps) // 8 * 8)         # multiple of 8
    bb = min(bb, (fit // 8) * 8)                   # respect the VMEM budget
    return int(max(8, bb))


def attention_pool(x, query, weight, bias, *, block_b=None):
    """x: (B, S, D); query: (1, D); weight: (D, D) torch (out,in); bias: (D,).

    Returns (B, D), matching AttentionPool.forward(x).
    """
    B, S, D = x.shape
    del bias  # q.b is constant over S -> cancels exactly inside the softmax

    # Hoist the linear projection out of the kernel (exact rewrite).  qw is
    # kept in f32 so the query path is not quantized early for bf16 inputs.
    qw = jnp.dot(
        query.astype(jnp.float32),
        weight.astype(jnp.float32),
        preferred_element_type=jnp.float32,
    ) * (1.0 / (D ** 0.5))                         # (1, D) f32

    itemsize = jnp.dtype(x.dtype).itemsize
    if block_b is None:
        block_b = _pick_block_b(B, S, D, itemsize)
    block_b = int(max(1, min(block_b, B)))
    grid = (pl.cdiv(B, block_b),)
    # Note: when B % block_b != 0 the padded rows of the last block compute a
    # throwaway per-row softmax that is masked out on writeback; there is no
    # cross-row reduction, so valid rows are unaffected.

    cost = pl.CostEstimate(
        flops=4 * B * S * D,            # score mul+add and pooled mul+add
        transcendentals=B * S,          # one exp per (b, s)
        bytes_accessed=B * S * D * itemsize + B * D * itemsize + D * 4,
    )

    return pl.pallas_call(
        _attention_pool_kernel,
        out_shape=jax.ShapeDtypeStruct((B, D), x.dtype),
        grid_spec=pltpu.PrefetchScalarGridSpec(
            num_scalar_prefetch=0,
            grid=grid,
            in_specs=[
                pl.BlockSpec((block_b, S, D), lambda b: (b, 0, 0)),
                pl.BlockSpec((1, D), lambda b: (0, 0)),
            ],
            out_specs=pl.BlockSpec((block_b, D), lambda b: (b, 0)),
        ),
        compiler_params=pltpu.CompilerParams(
            dimension_semantics=("parallel",),
            vmem_limit_bytes=_VMEM_LIMIT_BYTES,
        ),
        cost_estimate=cost,
    )(x, qw)


def attention_pool_ref(x, query, weight, bias):
    """Pure-JAX reference mirroring the PyTorch forward (with the bias)."""
    B, S, D = x.shape
    q = jnp.broadcast_to(query[None, :, :], (B, 1, D))          # (B, 1, D)
    k = jnp.einsum("bsd,od->bso", x, weight) + bias              # (B, S, D)
    scores = jnp.einsum("bqd,bkd->bqk", q, k) / (D ** 0.5)       # (B, 1, S)
    attn = jax.nn.softmax(scores, axis=-1)
    pooled = jnp.einsum("bqs,bsd->bqd", attn, x)                 # (B, 1, D)
    return pooled[:, 0, :]                                       # (B, D)


if __name__ == "__main__":
    key = jax.random.PRNGKey(0)
    k_x, k_q, k_w, k_b = jax.random.split(key, 4)

    B, S, D = 2, 8, 32
    x = jax.random.normal(k_x, (B, S, D), dtype=jnp.float32)

    # Parameter shapes match nn.Parameter(1, D) / nn.Linear(D, D).
    query = jax.random.normal(k_q, (1, D), dtype=jnp.float32)
    weight = jax.random.normal(k_w, (D, D), dtype=jnp.float32) * (1.0 / (D ** 0.5))
    bias = jax.random.normal(k_b, (D,), dtype=jnp.float32) * 0.01

    out = jax.block_until_ready(attention_pool(x, query, weight, bias))
    ref = attention_pool_ref(x, query, weight, bias)

    assert out.shape == (B, D)
    assert jnp.allclose(out, ref, atol=1e-4, rtol=1e-4), "mismatch vs reference"

    print("KERNEL_OK")
</pallas_src>

<mosaic_0001>
module attributes {stable_mosaic.version = 11 : i64} {
  func.func @_attention_pool_kernel(%arg0: i32, %arg1: memref<2x8x32xf32, #tpu.memory_space<vmem>>, %arg2: memref<1x32xf32, #tpu.memory_space<vmem>>, %arg3: memref<2x32xf32, #tpu.memory_space<vmem>>) attributes {dimension_semantics = [#tpu.dimension_semantics<parallel>], iteration_bounds = array<i64: 1>, scalar_prefetch = 0 : i64, scratch_operands = 0 : i64, tpu.core_type = #tpu.core_type<tc>, window_params = [{transform_indices = @transform_0, window_bounds = array<i64: 2, 8, 32>}, {pipeline_mode = #tpu.pipeline_mode<synchronous>, transform_indices = @transform_1, window_bounds = array<i64: 1, 32>}, {transform_indices = @transform_2, window_bounds = array<i64: 2, 32>}]} {
    %c0 = arith.constant 0 : index
    %c0_0 = arith.constant 0 : index
    %c0_1 = arith.constant 0 : index
    %0 = vector.load %arg1[%c0, %c0_0, %c0_1] : memref<2x8x32xf32, #tpu.memory_space<vmem>>, vector<2x8x32xf32>
    %c0_2 = arith.constant 0 : index
    %c0_3 = arith.constant 0 : index
    %1 = vector.load %arg2[%c0_2, %c0_3] : memref<1x32xf32, #tpu.memory_space<vmem>>, vector<1x32xf32>
    %2 = vector.shape_cast %1 : vector<1x32xf32> to vector<1x1x32xf32>
    %3 = vector.broadcast %2 : vector<1x1x32xf32> to vector<2x8x32xf32>
    %4 = arith.mulf %0, %3 : vector<2x8x32xf32>
    %cst = arith.constant dense<0.000000e+00> : vector<2x8xf32>
    %5 = vector.multi_reduction <add>, %4, %cst [2] : vector<2x8x32xf32> to vector<2x8xf32>
    %cst_4 = arith.constant dense<0xFF800000> : vector<2xf32>
    %6 = vector.multi_reduction <maximumf>, %5, %cst_4 [1] : vector<2x8xf32> to vector<2xf32>
    %7 = vector.shape_cast %6 : vector<2xf32> to vector<2x1xf32>
    %8 = vector.broadcast %7 : vector<2x1xf32> to vector<2x8xf32>
    %9 = arith.subf %5, %8 : vector<2x8xf32>
    %10 = math.exp %9 : vector<2x8xf32>
    %cst_5 = arith.constant dense<0.000000e+00> : vector<2xf32>
    %11 = vector.multi_reduction <add>, %10, %cst_5 [1] : vector<2x8xf32> to vector<2xf32>
    %12 = vector.shape_cast %11 : vector<2xf32> to vector<2x1xf32>
    %13 = vector.shape_cast %10 : vector<2x8xf32> to vector<2x8x1xf32>
    %14 = vector.broadcast %13 : vector<2x8x1xf32> to vector<2x8x32xf32>
    %15 = arith.mulf %14, %0 : vector<2x8x32xf32>
    %cst_6 = arith.constant dense<0.000000e+00> : vector<2x32xf32>
    %16 = vector.multi_reduction <add>, %15, %cst_6 [1] : vector<2x8x32xf32> to vector<2x32xf32>
    %17 = vector.broadcast %12 : vector<2x1xf32> to vector<2x32xf32>
    %18 = arith.divf %16, %17 : vector<2x32xf32>
    %c0_7 = arith.constant 0 : index
    %c0_8 = arith.constant 0 : index
    %19 = vector.load %arg3[%c0_7, %c0_8] : memref<2x32xf32, #tpu.memory_space<vmem>>, vector<2x32xf32>
    tpu.vector_store %arg3[%c0_7, %c0_8], %18 {strides = array<i32>} : memref<2x32xf32, #tpu.memory_space<vmem>>, vector<2x32xf32>,
    return
  }
  func.func @transform_0(%arg0: i32) -> (i32, i32, i32) {
    %c0_i32 = arith.constant 0 : i32
    %c0_i32_0 = arith.constant 0 : i32
    %c0_i32_1 = arith.constant 0 : i32
    return %arg0, %c0_i32, %c0_i32_0 : i32, i32, i32
  }
  func.func @transform_1(%arg0: i32) -> (i32, i32) {
    %c0_i32 = arith.constant 0 : i32
    %c0_i32_0 = arith.constant 0 : i32
    %c0_i32_1 = arith.constant 0 : i32
    return %c0_i32, %c0_i32_0 : i32, i32
  }
  func.func @transform_2(%arg0: i32) -> (i32, i32) {
    %c0_i32 = arith.constant 0 : i32
    %c0_i32_0 = arith.constant 0 : i32
    return %arg0, %c0_i32 : i32, i32
  }
}

</mosaic_0001>

<bundles_post_ra>
// kernel: tpu_custom_call.1
= control target key start
LH: loop header
LB: loop body
LE: loop exit
PB: predicated region body
PF: predicated region fallthrough
CT: control target
= control target key end

     0   :  { %7 = vsyncpa [#allocation3], 0  ;;  %s269_s0 = inlined_call_operand.hbm [shape: f32[2,8,32], index: 0, kind: input, shape index: {}]   ;;  %s270_s1 = inlined_call_operand.vmem [shape: f32[1,32], index: 1, kind: input, shape index: {}]   ;;  %s271_s2 = inlined_call_operand.hbm [shape: f32[2,32], index: 2, kind: output, shape index: {}]  }
   0x1   :  { %8 = vsyncpa [#allocation4], 0  ;;  %s213_s9 = smov [#allocation2]   ;;  %s165_s13 = scalar_lea.hbm %s269_s0, 256 }
   0x2   :  { %s14_s10 = sshll.u32 %s213_s9, 4  ;;  %p166_p0 = scmp.ne.s32.totalorder %s269_s0, %s165_s13  ;;  %s15_s10 = int_to_ptr.vmem [resolvable:$true] %s14_s10 }
   0x3   :  { %p169_p1 = scmp.lt.u32.totalorder %s165_s13, %s269_s0 }
   0x5   :  { %p171_p2 = pnand %p169_p1, %p166_p0 }
   0x7   :  { %174 = shalt.err (!%p171_p2)
}
   0x8   :  { %s175_s18 = scalar_lea.vmem %s15_s10, 256  ;;  %p180_p4 = scmp.lt.s32.totalorder %s15_s10, %s15_s10 }
   0x9   :  { %p176_p3 = scmp.ne.s32.totalorder %s15_s10, %s175_s18  ;;  %p181_p5 = scmp.lt.s32.totalorder %s175_s18, %s175_s18 }
   0xb   :  { %p182_p6 = por %p181_p5, %p180_p4 }
   0xd   :  { %p183_p7 = pnand %p182_p6, %p176_p3 }
   0xf   :  { %186 = shalt.err (!%p183_p7)
}
  0x10   :  { %s214_s19 = smov 128   ;;  %s215_s20 = smov 8  }
  0x11   :  { %20 = dma.hbm_to_vmem [thread:$0]  %s269_s0, 256, %s15_s10, [#allocation3], %s214_s19, %s214_s19, %s215_s20  }
  0x12   :  { %209 = dma.done.wait [#allocation3], 256  }
  0x13   :  { %210 = vsyncadd [#allocation3], 4294967040  ;;  %v26_v0 = vld [vmem:[#allocation2] sm:$0xff]  ;;  %vm37_vm0 = vcmask 261120   ;;  %v27_v2 = vld [vmem:[#allocation2 + $0x8] sm:$0xff]  ;;  %v46_v7 = vlaneseq  ;;  %vm56_vm1 = vcmask 1041409  }
  0x14   :  { %v149_v1 = vld [vmem:[%s270_s1] ss:$0 sm:$0xff]  ;;  %vm59_vm2 = vcmask 58368   ;;  %v216_v17 = vmov 0   ;;  %s217_s0 = smov [#allocation5]   ;;  %vm132_vm3 = vcmask 254976  }
  0x15   :  { %v35_v3 = vmul.f32 %v149_v1, %v26_v0  ;;  %v36_v4 = vmul.f32 %v149_v1, %v27_v2  ;;  %v47_v8 = vand.u32 127, %v46_v7  ;;  %v49_v9 = vshrl.u32 %v46_v7, 7  ;;  %156 = vset.pattern.permute.xlu0 %v216_v17  ;;  %155 = vset.pattern.permute.xlu1 %v216_v17  ;;  %s140_s1 = sshll.u32 %s217_s0, 4  ;;  %s141_s1 = int_to_ptr.vmem [resolvable:$true] %s140_s1 }
  0x16   :  { %s187_s25 = scalar_lea.vmem %s141_s1, 32  ;;  %p192_p9 = scmp.lt.s32.totalorder %s141_s1, %s141_s1 }
  0x17   :  { %v38_v5 = vsel %vm37_vm0, %v35_v3, 0.0  ;;  %v41_v6 = vsel %vm37_vm0, %v36_v4, 0.0  ;;  %v50_v11 = vsub.s32 %v47_v8, %v49_v9  ;;  %v66_v18 = vsub.s32 0, %v49_v9  ;;  %p188_p8 = scmp.ne.s32.totalorder %s141_s1, %s187_s25  ;;  %p193_p10 = scmp.lt.s32.totalorder %s187_s25, %s187_s25 }
  0x18   :  { %39 = vadd.xlane.f32.xlu0 %v38_v5  ;;  %v70_v19 = vsub.s32 1, %v49_v9 }
  0x19   :  { %p194_p11 = por %p193_p10, %p192_p9 }
  0x1b   :  { %p195_p12 = pnand %p194_p11, %p188_p8 }
  0x1c   :  { %42 = vadd.xlane.f32.xlu0 %v41_v6 }
  0xa5   :  { %v40_v10 = vpop.xlane.xlu0 %39 }
  0xa6   :  { %v51_v13 = vrot.slane %v40_v10, %v50_v11 }
  0xa9   :  { %v43_v12 = vpop.xlane.xlu0 %42 }
  0xaa   :  { %v55_v14 = vrot.slane %v43_v12, %v50_v11 }
  0xac   :  { %v57_v15 = vsel %vm56_vm1, %v55_v14, %v51_v13 }
  0xad   :  { %v60_v16 = vsel %vm59_vm2, %v57_v15, -inf }
  0xae   :  { %61 = vmax.xlane.f32.xlu1 %v60_v16 }
 0x13b   :  { %v62_v20 = vpop.xlane.xlu1 %61 }
 0x13c   :  { %v67_v21 = vrot.slane %v62_v20, %v66_v18  ;;  %v71_v22 = vrot.slane %v62_v20, %v70_v19 }
 0x13e   :  { %v74_v23 = vsub.f32 %v40_v10, %v67_v21  ;;  %v75_v24 = vsub.f32 %v43_v12, %v71_v22 }
 0x140   :  { %v76_v25 = vmul.f32 1.442695, %v74_v23  ;;  %v78_v26 = vmul.f32 1.442695, %v75_v24 }
 0x142   :  { %157 = vpow2.f32 %v76_v25 }
 0x143   :  { %159 = vpow2.f32 %v78_v26 }
 0x14c   :  { %v158_v27 = vpop.eup %157 }
 0x14d   :  { %v160_v28 = vpop.eup %159  ;;  %83 = vperm.xlu1 %155, %v158_v27  }
 0x14e   :  { %86 = vperm.xlu0 %156, %v160_v28  }
 0x1cc   :  { %v84_v29 = vpop.permute.xlu1 %83 }
 0x1cd   :  { %v87_v30 = vpop.permute.xlu0 %86  ;;  %v91_v31 = vrot.slane %v84_v29, %v50_v11  ;;  %v103_v36 = vmul.f32 %v84_v29, %v26_v0 }
 0x1ce   :  { %v95_v32 = vrot.slane %v87_v30, %v50_v11  ;;  %v104_v35 = vmul.f32 %v87_v30, %v27_v2 }
 0x1cf   :  { %v105_v38 = vsel %vm37_vm0, %v103_v36, 0.0 }
 0x1d0   :  { %v96_v33 = vsel %vm56_vm1, %v95_v32, %v91_v31  ;;  %v112_v37 = vsel %vm37_vm0, %v104_v35, 0.0  ;;  %v106_v40 = vrot.slane %v105_v38, 4 }
 0x1d1   :  { %v98_v34 = vsel %vm59_vm2, %v96_v33, 0.0  ;;  %v113_v39 = vrot.slane %v112_v37, 4 }
 0x1d2   :  { %99 = vadd.xlane.f32.xlu1 %v98_v34  ;;  %v107_v42 = vadd.f32 %v106_v40, %v105_v38 }
 0x1d3   :  { %v114_v41 = vadd.f32 %v113_v39, %v112_v37 }
 0x1d4   :  { %v108_v46 = vrot.slane %v107_v42, 2 }
 0x1d5   :  { %v115_v43 = vrot.slane %v114_v41, 2 }
 0x1d6   :  { %v109_v48 = vadd.f32 %v108_v46, %v107_v42 }
 0x1d7   :  { %v116_v47 = vadd.f32 %v115_v43, %v114_v41 }
 0x1d8   :  { %v110_v50 = vrot.slane %v109_v48, 1 }
 0x1d9   :  { %v117_v49 = vrot.slane %v116_v47, 1 }
 0x1da   :  { %v111_v54 = vadd.f32 %v110_v50, %v109_v48 }
 0x1db   :  { %v118_v52 = vadd.f32 %v117_v49, %v116_v47 }
 0x25f   :  { %v100_v44 = vpop.xlane.xlu1 %99 }
 0x260   :  { %v120_v45 = vrot.slane %v100_v44, 1  ;;  %161 = vrcp.f32 %v100_v44 }
 0x262   :  { %163 = vrcp.f32 %v120_v45 }
 0x26a   :  { %v162_v51 = vpop.eup %161 }
 0x26b   :  { %v124_v56 = vmul.f32 %v162_v51, %v111_v54 }
 0x26c   :  { %v164_v53 = vpop.eup %163 }
 0x26d   :  { %v126_v55 = vmul.f32 %v164_v53, %v118_v52 }
 0x26f   :  { %v129_v57 = vrot.slane %v126_v55, 7 }
 0x271   :  { %v130_v58 = vsel %vm56_vm1, %v129_v57, %v124_v56 }
 0x272   :  { %133 = vst.msk [vmem:[#allocation5] sm:$0x3] %vm132_vm3, %v130_v58 }
 0x273   :  { %198 = shalt.err (!%p195_p12)
}
 0x274   :  { %s199_s28 = scalar_lea.hbm %s271_s2, 32 }
 0x275   :  { %p200_p13 = scmp.ne.s32.totalorder %s271_s2, %s199_s28  ;;  %p203_p0 = scmp.lt.u32.totalorder %s199_s28, %s271_s2 }
 0x277   :  { %p205_p1 = pnand %p203_p0, %p200_p13 }
 0x279   :  { %208 = shalt.err (!%p205_p1)
}
 0x27a   :  { %143 = dma.vmem_to_hbm [thread:$0]  %s141_s1, 32, %s271_s2, [#allocation4]  }
 0x27b   :  { %211 = dma.done.wait [#allocation4], 32  }
 0x27c   :  { %212 = vsyncadd [#allocation4], 4294967264 }
 0x27d   :  { %147 = vsyncpa [#allocation3], 1 }
 0x27e   :  { %148 = vsyncpa [#allocation4], 1 }

</bundles_post_ra>
